<compile_context>
chip_gen: v7x
topology: tpu7x:2x2x1
jax: 0.10.0
libtpu: 0.0.40
codegen_flags: <defaults>
</compile_context>

<pallas_src>
import functools

import jax
import jax.numpy as jnp
from jax.experimental import pallas as pl
from jax.experimental.pallas import tpu as pltpu


def _lnmlp_kernel(x_ref, gamma_ref, beta_ref, w1t_ref, b1_ref, w2t_ref, b2_ref,
                  o_ref, *, eps):
    # x_ref: (TM, H) token tile. LayerNorm / bias / GELU math stays in f32 on the
    # VPU/EUP; only the matmul operands are cast to the weight storage dtype.
    x = x_ref[...].astype(jnp.float32)

    # --- LayerNorm over last dim ---
    mean = jnp.mean(x, axis=-1, keepdims=True)
    centered = x - mean
    var = jnp.mean(centered * centered, axis=-1, keepdims=True)
    y = centered * jax.lax.rsqrt(var + eps)
    y = y * gamma_ref[...].astype(jnp.float32) + beta_ref[...].astype(jnp.float32)

    # --- fc1: (TM, H) @ (H, F) + b1 --- (weights kept in storage dtype, f32 acc)
    h = jnp.dot(y.astype(w1t_ref.dtype), w1t_ref[...],
                preferred_element_type=jnp.float32)
    h = h + b1_ref[...].astype(jnp.float32)

    # --- activation (GELU) ---
    # TODO(synk): PyTorch F.gelu default is the exact erf form; tanh approx used
    # here for a Mosaic-friendly EUP lowering (difference ~1e-3 relative).
    h = jax.nn.gelu(h, approximate=True)

    # --- fc2: (TM, F) @ (F, H) + b2 ---
    out = jnp.dot(h.astype(w2t_ref.dtype), w2t_ref[...],
                  preferred_element_type=jnp.float32)
    out = out + b2_ref[...].astype(jnp.float32)

    o_ref[...] = out.astype(o_ref.dtype)


def _round_up(x, m):
    return (x + m - 1) // m * m


def layer_norm_mlp(x, ln_weight, ln_bias, fc1_weight, fc1_bias, fc2_weight,
                   fc2_bias, *, eps=1e-5, token_tile=256):
    """x: (..., hidden). fc1_weight: (ffn, hidden), fc2_weight: (hidden, ffn)
    (PyTorch nn.Linear convention: out_features x in_features)."""
    orig_shape = x.shape
    H = orig_shape[-1]
    F = fc1_weight.shape[0]
    xf = x.reshape(-1, H)
    N = xf.shape[0]

    # Token tile: large enough to fill MXU rows / amortize grid-step overhead,
    # but never larger than the (sublane-rounded) token count.
    tm = _round_up(min(token_tile, _round_up(N, 8)), 8)
    n_pad = _round_up(N, tm)
    if n_pad != N:
        # Zero padding is safe: padded rows produce finite junk that is sliced off.
        xf = jnp.pad(xf, ((0, n_pad - N), (0, 0)))

    # Pre-transpose weights once (glue, outside the kernel hot path).
    w1t = fc1_weight.T            # (H, F)
    w2t = fc2_weight.T            # (F, H)
    gamma = ln_weight.reshape(1, H)
    beta = ln_bias.reshape(1, H)
    b1 = fc1_bias.reshape(1, F)
    b2 = fc2_bias.reshape(1, H)

    # VMEM budget: double-buffered weights + x/out tiles + f32 intermediates.
    # TODO(synk): for very large H*F (e.g. v7x's 64 MiB VMEM) the weights should be
    # tiled over the FFN dim with a VMEM accumulator instead of full residency.
    w_itemsize = jnp.dtype(fc1_weight.dtype).itemsize
    x_itemsize = jnp.dtype(x.dtype).itemsize
    w_bytes = 2 * H * F * w_itemsize                       # both weight matrices
    tile_bytes = tm * (2 * H * x_itemsize + 4 * (2 * H + 2 * F))
    vmem_needed = 2 * w_bytes + 2 * tile_bytes + 4 * (2 * H + 2 * F)
    vmem_limit = int(min(max(int(vmem_needed * 1.5), 32 * 1024 * 1024),
                         64 * 1024 * 1024))

    grid = (n_pad // tm,)
    kernel = functools.partial(_lnmlp_kernel, eps=eps)

    out = pl.pallas_call(
        kernel,
        out_shape=jax.ShapeDtypeStruct((n_pad, H), x.dtype),
        grid_spec=pltpu.PrefetchScalarGridSpec(
            num_scalar_prefetch=0,
            grid=grid,
            in_specs=[
                pl.BlockSpec((tm, H), lambda i: (i, 0)),   # x tile
                pl.BlockSpec((1, H), lambda i: (0, 0)),    # ln gamma
                pl.BlockSpec((1, H), lambda i: (0, 0)),    # ln beta
                pl.BlockSpec((H, F), lambda i: (0, 0)),    # fc1 W^T
                pl.BlockSpec((1, F), lambda i: (0, 0)),    # fc1 bias
                pl.BlockSpec((F, H), lambda i: (0, 0)),    # fc2 W^T
                pl.BlockSpec((1, H), lambda i: (0, 0)),    # fc2 bias
            ],
            out_specs=pl.BlockSpec((tm, H), lambda i: (i, 0)),
        ),
        compiler_params=pltpu.CompilerParams(
            dimension_semantics=("parallel",),
            vmem_limit_bytes=vmem_limit),
    )(xf, gamma, beta, w1t, b1, w2t, b2)

    if n_pad != N:
        out = out[:N]
    return out.reshape(orig_shape)


def _reference(x, ln_weight, ln_bias, fc1_weight, fc1_bias, fc2_weight,
               fc2_bias, eps):
    xf = x.astype(jnp.float32)
    mean = jnp.mean(xf, axis=-1, keepdims=True)
    var = jnp.mean((xf - mean) ** 2, axis=-1, keepdims=True)
    y = (xf - mean) * jax.lax.rsqrt(var + eps) * ln_weight + ln_bias
    h = y @ fc1_weight.T.astype(jnp.float32) + fc1_bias
    h = jax.nn.gelu(h, approximate=True)
    out = h @ fc2_weight.T.astype(jnp.float32) + fc2_bias
    return out.astype(x.dtype)


if __name__ == "__main__":
    # Small shapes consistent with the module: tokens come from (batch, seq),
    # hidden / ffn_hidden from __init__.
    batch, seq = 2, 8
    hidden_size = 128
    ffn_hidden_size = 256
    eps = 1e-5
    TRUNC_NORMAL_STD = 0.02

    key = jax.random.PRNGKey(0)
    kx, k1, k2 = jax.random.split(key, 3)

    x = jax.random.normal(kx, (batch, seq, hidden_size), dtype=jnp.float32)

    # Deterministic parameter init (mirrors reset_parameters()).
    ln_weight = jnp.ones((hidden_size,), jnp.float32)
    ln_bias = jnp.zeros((hidden_size,), jnp.float32)
    fc1_weight = (TRUNC_NORMAL_STD *
                  jax.random.truncated_normal(k1, -2.0, 2.0,
                                              (ffn_hidden_size, hidden_size),
                                              jnp.float32))
    fc2_weight = (TRUNC_NORMAL_STD *
                  jax.random.truncated_normal(k2, -2.0, 2.0,
                                              (hidden_size, ffn_hidden_size),
                                              jnp.float32))
    fc1_bias = jnp.zeros((ffn_hidden_size,), jnp.float32)
    fc2_bias = jnp.zeros((hidden_size,), jnp.float32)

    out = layer_norm_mlp(x, ln_weight, ln_bias, fc1_weight, fc1_bias,
                         fc2_weight, fc2_bias, eps=eps, token_tile=256)
    out = jax.block_until_ready(out)

    ref = _reference(x, ln_weight, ln_bias, fc1_weight, fc1_bias,
                     fc2_weight, fc2_bias, eps)
    assert out.shape == x.shape
    assert jnp.allclose(out, ref, atol=1e-4, rtol=1e-4), "mismatch vs reference"

    print("KERNEL_OK")
</pallas_src>

<mosaic_0001>
module attributes {stable_mosaic.version = 11 : i64} {
  func.func @_lnmlp_kernel(%arg0: i32, %arg1: memref<16x128xf32, #tpu.memory_space<vmem>>, %arg2: memref<1x128xf32, #tpu.memory_space<vmem>>, %arg3: memref<1x128xf32, #tpu.memory_space<vmem>>, %arg4: memref<128x256xf32, #tpu.memory_space<vmem>>, %arg5: memref<1x256xf32, #tpu.memory_space<vmem>>, %arg6: memref<256x128xf32, #tpu.memory_space<vmem>>, %arg7: memref<1x128xf32, #tpu.memory_space<vmem>>, %arg8: memref<16x128xf32, #tpu.memory_space<vmem>>) attributes {dimension_semantics = [#tpu.dimension_semantics<parallel>], iteration_bounds = array<i64: 1>, scalar_prefetch = 0 : i64, scratch_operands = 0 : i64, tpu.core_type = #tpu.core_type<tc>, window_params = [{transform_indices = @transform_0, window_bounds = array<i64: 16, 128>}, {pipeline_mode = #tpu.pipeline_mode<synchronous>, transform_indices = @transform_1, window_bounds = array<i64: 1, 128>}, {pipeline_mode = #tpu.pipeline_mode<synchronous>, transform_indices = @transform_2, window_bounds = array<i64: 1, 128>}, {pipeline_mode = #tpu.pipeline_mode<synchronous>, transform_indices = @transform_3, window_bounds = array<i64: 128, 256>}, {pipeline_mode = #tpu.pipeline_mode<synchronous>, transform_indices = @transform_4, window_bounds = array<i64: 1, 256>}, {pipeline_mode = #tpu.pipeline_mode<synchronous>, transform_indices = @transform_5, window_bounds = array<i64: 256, 128>}, {pipeline_mode = #tpu.pipeline_mode<synchronous>, transform_indices = @transform_6, window_bounds = array<i64: 1, 128>}, {transform_indices = @transform_7, window_bounds = array<i64: 16, 128>}]} {
    %c0 = arith.constant 0 : index
    %c0_0 = arith.constant 0 : index
    %0 = vector.load %arg1[%c0, %c0_0] : memref<16x128xf32, #tpu.memory_space<vmem>>, vector<16x128xf32>
    %cst = arith.constant dense<0.000000e+00> : vector<16xf32>
    %1 = vector.multi_reduction <add>, %0, %cst [1] : vector<16x128xf32> to vector<16xf32>
    %2 = vector.shape_cast %1 : vector<16xf32> to vector<16x1xf32>
    %cst_1 = arith.constant 1.280000e+02 : f32
    %3 = vector.broadcast %cst_1 : f32 to vector<16x1xf32>
    %4 = arith.divf %2, %3 : vector<16x1xf32>
    %5 = vector.broadcast %4 : vector<16x1xf32> to vector<16x128xf32>
    %6 = arith.subf %0, %5 : vector<16x128xf32>
    %7 = arith.mulf %6, %6 : vector<16x128xf32>
    %cst_2 = arith.constant dense<0.000000e+00> : vector<16xf32>
    %8 = vector.multi_reduction <add>, %7, %cst_2 [1] : vector<16x128xf32> to vector<16xf32>
    %9 = vector.shape_cast %8 : vector<16xf32> to vector<16x1xf32>
    %cst_3 = arith.constant 1.280000e+02 : f32
    %10 = vector.broadcast %cst_3 : f32 to vector<16x1xf32>
    %11 = arith.divf %9, %10 : vector<16x1xf32>
    %cst_4 = arith.constant 9.99999974E-6 : f32
    %12 = vector.broadcast %cst_4 : f32 to vector<16x1xf32>
    %13 = arith.addf %11, %12 : vector<16x1xf32>
    %14 = math.rsqrt %13 : vector<16x1xf32>
    %15 = vector.broadcast %14 : vector<16x1xf32> to vector<16x128xf32>
    %16 = arith.mulf %6, %15 : vector<16x128xf32>
    %c0_5 = arith.constant 0 : index
    %c0_6 = arith.constant 0 : index
    %17 = vector.load %arg2[%c0_5, %c0_6] : memref<1x128xf32, #tpu.memory_space<vmem>>, vector<1x128xf32>
    %18 = vector.broadcast %17 : vector<1x128xf32> to vector<16x128xf32>
    %19 = arith.mulf %16, %18 : vector<16x128xf32>
    %c0_7 = arith.constant 0 : index
    %c0_8 = arith.constant 0 : index
    %20 = vector.load %arg3[%c0_7, %c0_8] : memref<1x128xf32, #tpu.memory_space<vmem>>, vector<1x128xf32>
    %21 = vector.broadcast %20 : vector<1x128xf32> to vector<16x128xf32>
    %22 = arith.addf %19, %21 : vector<16x128xf32>
    %c0_9 = arith.constant 0 : index
    %c0_10 = arith.constant 0 : index
    %23 = vector.load %arg4[%c0_9, %c0_10] : memref<128x256xf32, #tpu.memory_space<vmem>>, vector<128x256xf32>
    %cst_11 = arith.constant dense<0.000000e+00> : vector<16x256xf32>
    %24 = tpu.matmul %22, %23, %cst_11 {dimension_numbers = #tpu.dot_dimension_numbers<[1], [0], [0], [1], [0, 0, 1, 1], [], []>} : vector<16x128xf32>, vector<128x256xf32>, vector<16x256xf32> -> vector<16x256xf32>
    %c0_12 = arith.constant 0 : index
    %c0_13 = arith.constant 0 : index
    %25 = vector.load %arg5[%c0_12, %c0_13] : memref<1x256xf32, #tpu.memory_space<vmem>>, vector<1x256xf32>
    %26 = vector.broadcast %25 : vector<1x256xf32> to vector<16x256xf32>
    %27 = arith.addf %24, %26 : vector<16x256xf32>
    %28 = arith.mulf %27, %27 : vector<16x256xf32>
    %29 = arith.mulf %27, %28 : vector<16x256xf32>
    %cst_14 = arith.constant 4.471500e-02 : f32
    %30 = vector.broadcast %cst_14 : f32 to vector<16x256xf32>
    %31 = arith.mulf %30, %29 : vector<16x256xf32>
    %32 = arith.addf %27, %31 : vector<16x256xf32>
    %cst_15 = arith.constant 0.797884583 : f32
    %33 = vector.broadcast %cst_15 : f32 to vector<16x256xf32>
    %34 = arith.mulf %33, %32 : vector<16x256xf32>
    %35 = math.tanh %34 : vector<16x256xf32>
    %cst_16 = arith.constant 1.000000e+00 : f32
    %36 = vector.broadcast %cst_16 : f32 to vector<16x256xf32>
    %37 = arith.addf %36, %35 : vector<16x256xf32>
    %cst_17 = arith.constant 5.000000e-01 : f32
    %38 = vector.broadcast %cst_17 : f32 to vector<16x256xf32>
    %39 = arith.mulf %38, %37 : vector<16x256xf32>
    %40 = arith.mulf %27, %39 : vector<16x256xf32>
    %c0_18 = arith.constant 0 : index
    %c0_19 = arith.constant 0 : index
    %41 = vector.load %arg6[%c0_18, %c0_19] : memref<256x128xf32, #tpu.memory_space<vmem>>, vector<256x128xf32>
    %cst_20 = arith.constant dense<0.000000e+00> : vector<16x128xf32>
    %42 = tpu.matmul %40, %41, %cst_20 {dimension_numbers = #tpu.dot_dimension_numbers<[1], [0], [0], [1], [0, 0, 1, 1], [], []>} : vector<16x256xf32>, vector<256x128xf32>, vector<16x128xf32> -> vector<16x128xf32>
    %c0_21 = arith.constant 0 : index
    %c0_22 = arith.constant 0 : index
    %43 = vector.load %arg7[%c0_21, %c0_22] : memref<1x128xf32, #tpu.memory_space<vmem>>, vector<1x128xf32>
    %44 = vector.broadcast %43 : vector<1x128xf32> to vector<16x128xf32>
    %45 = arith.addf %42, %44 : vector<16x128xf32>
    %c0_23 = arith.constant 0 : index
    %c0_24 = arith.constant 0 : index
    %46 = vector.load %arg8[%c0_23, %c0_24] : memref<16x128xf32, #tpu.memory_space<vmem>>, vector<16x128xf32>
    tpu.vector_store %arg8[%c0_23, %c0_24], %45 {strides = array<i32>} : memref<16x128xf32, #tpu.memory_space<vmem>>, vector<16x128xf32>,
    return
  }
  func.func @transform_0(%arg0: i32) -> (i32, i32) {
    %c0_i32 = arith.constant 0 : i32
    %c0_i32_0 = arith.constant 0 : i32
    return %arg0, %c0_i32 : i32, i32
  }
  func.func @transform_1(%arg0: i32) -> (i32, i32) {
    %c0_i32 = arith.constant 0 : i32
    %c0_i32_0 = arith.constant 0 : i32
    %c0_i32_1 = arith.constant 0 : i32
    return %c0_i32, %c0_i32_0 : i32, i32
  }
  func.func @transform_2(%arg0: i32) -> (i32, i32) {
    %c0_i32 = arith.constant 0 : i32
    %c0_i32_0 = arith.constant 0 : i32
    %c0_i32_1 = arith.constant 0 : i32
    return %c0_i32, %c0_i32_0 : i32, i32
  }
  func.func @transform_3(%arg0: i32) -> (i32, i32) {
    %c0_i32 = arith.constant 0 : i32
    %c0_i32_0 = arith.constant 0 : i32
    %c0_i32_1 = arith.constant 0 : i32
    return %c0_i32, %c0_i32_0 : i32, i32
  }
  func.func @transform_4(%arg0: i32) -> (i32, i32) {
    %c0_i32 = arith.constant 0 : i32
    %c0_i32_0 = arith.constant 0 : i32
    %c0_i32_1 = arith.constant 0 : i32
    return %c0_i32, %c0_i32_0 : i32, i32
  }
  func.func @transform_5(%arg0: i32) -> (i32, i32) {
    %c0_i32 = arith.constant 0 : i32
    %c0_i32_0 = arith.constant 0 : i32
    %c0_i32_1 = arith.constant 0 : i32
    return %c0_i32, %c0_i32_0 : i32, i32
  }
  func.func @transform_6(%arg0: i32) -> (i32, i32) {
    %c0_i32 = arith.constant 0 : i32
    %c0_i32_0 = arith.constant 0 : i32
    %c0_i32_1 = arith.constant 0 : i32
    return %c0_i32, %c0_i32_0 : i32, i32
  }
  func.func @transform_7(%arg0: i32) -> (i32, i32) {
    %c0_i32 = arith.constant 0 : i32
    %c0_i32_0 = arith.constant 0 : i32
    return %arg0, %c0_i32 : i32, i32
  }
}

</mosaic_0001>

<bundles_post_ra>
// kernel: tpu_custom_call.1
= control target key start
LH: loop header
LB: loop body
LE: loop exit
PB: predicated region body
PF: predicated region fallthrough
CT: control target
= control target key end

     0   :  { %12 = vsyncpa [#allocation3], 0  ;;  %s740_s0 = inlined_call_operand.hbm [shape: f32[16,128], index: 0, kind: input, shape index: {}]   ;;  %s741_s1 = inlined_call_operand.vmem [shape: f32[1,128], index: 1, kind: input, shape index: {}]   ;;  %s742_s2 = inlined_call_operand.vmem [shape: f32[1,128], index: 2, kind: input, shape index: {}]   ;;  %s743_s3 = inlined_call_operand.hbm [shape: f32[128,256], index: 3, kind: input, shape index: {}]   ;;  %s744_s4 = inlined_call_operand.vmem [shape: f32[1,256], index: 4, kind: input, shape index: {}]   ;;  %s745_s5 = inlined_call_operand.hbm [shape: f32[256,128], index: 5, kind: input, shape index: {}]   ;;  %s746_s6 = inlined_call_operand.vmem [shape: f32[1,128], index: 6, kind: input, shape index: {}]   ;;  %s747_s7 = inlined_call_operand.hbm [shape: f32[16,128], index: 7, kind: output, shape index: {}]  }
   0x1   :  { %13 = vsyncpa [#allocation6], 0 }
   0x2   :  { %14 = vsyncpa [#allocation4], 0  ;;  %s622_s24 = smov [#allocation5]   ;;  %s528_s28 = scalar_lea.hbm %s743_s3, 4096 }
   0x3   :  { %s36_s25 = sshll.u32 %s622_s24, 4  ;;  %p529_p0 = scmp.ne.s32.totalorder %s743_s3, %s528_s28  ;;  %s37_s25 = int_to_ptr.vmem [resolvable:$true] %s36_s25 }
   0x4   :  { %p532_p1 = scmp.lt.u32.totalorder %s528_s28, %s743_s3 }
   0x6   :  { %p534_p2 = pnand %p532_p1, %p529_p0 }
   0x8   :  { %537 = shalt.err (!%p534_p2)
}
   0x9   :  { %s538_s10 = scalar_lea.vmem %s37_s25, 4096  ;;  %p543_p4 = scmp.lt.s32.totalorder %s37_s25, %s37_s25 }
   0xa   :  { %p539_p3 = scmp.ne.s32.totalorder %s37_s25, %s538_s10  ;;  %p544_p5 = scmp.lt.s32.totalorder %s538_s10, %s538_s10 }
   0xc   :  { %p545_p6 = por %p544_p5, %p543_p4 }
   0xe   :  { %p546_p7 = pnand %p545_p6, %p539_p3 }
  0x10   :  { %549 = shalt.err (!%p546_p7)
}
  0x11   :  { %s623_s11 = smov 256   ;;  %s624_s12 = smov 16  }
  0x12   :  { %42 = dma.hbm_to_vmem [thread:$0]  %s743_s3, 4096, %s37_s25, [#allocation6], %s623_s11, %s623_s11, %s624_s12  }
  0x13   :  { %s625_s15 = smov [#allocation2]   ;;  %s550_s19 = scalar_lea.hbm %s740_s0, 256 }
  0x14   :  { %s20_s16 = sshll.u32 %s625_s15, 4  ;;  %p551_p8 = scmp.ne.s32.totalorder %s740_s0, %s550_s19  ;;  %s21_s16 = int_to_ptr.vmem [resolvable:$true] %s20_s16 }
  0x15   :  { %p554_p9 = scmp.lt.u32.totalorder %s550_s19, %s740_s0 }
  0x17   :  { %p556_p10 = pnand %p554_p9, %p551_p8 }
  0x19   :  { %559 = shalt.err (!%p556_p10)
}
  0x1a   :  { %s560_s24 = scalar_lea.vmem %s21_s16, 256  ;;  %p565_p12 = scmp.lt.s32.totalorder %s21_s16, %s21_s16 }
  0x1b   :  { %p561_p11 = scmp.ne.s32.totalorder %s21_s16, %s560_s24  ;;  %p566_p13 = scmp.lt.s32.totalorder %s560_s24, %s560_s24 }
  0x1d   :  { %p567_p0 = por %p566_p13, %p565_p12 }
  0x1f   :  { %p568_p1 = pnand %p567_p0, %p561_p11 }
  0x21   :  { %571 = shalt.err (!%p568_p1)
}
  0x22   :  { %s626_s3 = smov 128   ;;  %s627_s25 = smov 8  }
  0x23   :  { %26 = dma.hbm_to_vmem [thread:$0]  %s740_s0, 256, %s21_s16, [#allocation3], %s626_s3, %s626_s3, %s627_s25  }
  0x24   :  { %s628_s28 = smov [#allocation7]   ;;  %s572_s9 = scalar_lea.hbm %s745_s5, 4096 }
  0x25   :  { %s50_s29 = sshll.u32 %s628_s28, 4  ;;  %p573_p2 = scmp.ne.s32.totalorder %s745_s5, %s572_s9  ;;  %s51_s29 = int_to_ptr.vmem [resolvable:$true] %s50_s29 }
  0x26   :  { %p576_p3 = scmp.lt.u32.totalorder %s572_s9, %s745_s5 }
  0x28   :  { %p578_p4 = pnand %p576_p3, %p573_p2 }
  0x2a   :  { %581 = shalt.err (!%p578_p4)
}
  0x2b   :  { %s582_s14 = scalar_lea.vmem %s51_s29, 4096  ;;  %p587_p6 = scmp.lt.s32.totalorder %s51_s29, %s51_s29 }
  0x2c   :  { %p583_p5 = scmp.ne.s32.totalorder %s51_s29, %s582_s14  ;;  %p588_p7 = scmp.lt.s32.totalorder %s582_s14, %s582_s14 }
  0x2e   :  { %p589_p8 = por %p588_p7, %p587_p6 }
  0x30   :  { %p590_p9 = pnand %p589_p8, %p583_p5 }
  0x32   :  { %593 = shalt.err (!%p590_p9)
}
  0x33   :  { %56 = dma.hbm_to_vmem [thread:$0]  %s745_s5, 4096, %s51_s29, [#allocation6], %s626_s3, %s626_s3, %s627_s25  }
  0x34   :  { %616 = dma.done.wait [#allocation3], 256  }
  0x35   :  { %617 = vsyncadd [#allocation3], 4294967040 }
  0x36   :  { %618 = dma.done.wait [#allocation6], 8192  }
  0x37   :  { %619 = vsyncadd [#allocation6], 4294959104  ;;  %v68_v0 = vld [vmem:[#allocation2] sm:$0xff]  ;;  %v69_v1 = vld [vmem:[#allocation2 + $0x8] sm:$0xff]  ;;  %v629_v53 = vmov 0.0   ;;  %s630_s20 = smov [#allocation8]  }
  0x38   :  { %70 = vadd.xlane.f32.xlu0 %v68_v0  ;;  %v112_v2 = vld [vmem:[#allocation5 + $0x8] sm:$0xff]  ;;  %v114_v3 = vld [vmem:[#allocation5 + $0x18] sm:$0xff]  ;;  %v111_v4 = vld [vmem:[#allocation5] sm:$0xff]  ;;  %219 = vmatprep.mubr.f32.mxu0 %v629_v53  ;;  %s389_s21 = sshll.u32 %s630_s20, 4  ;;  %s390_s21 = int_to_ptr.vmem [resolvable:$true] %s389_s21 }
  0x39   :  { %v443_v5 = vpack.c.bf16 %v114_v3, %v112_v2  ;;  %v113_v6 = vld [vmem:[#allocation5 + $0x10] sm:$0xff]  ;;  %v116_v7 = vld [vmem:[#allocation5 + $0x28] sm:$0xff]  ;;  %v118_v8 = vld [vmem:[#allocation5 + $0x38] sm:$0xff]  ;;  %s594_s22 = scalar_lea.vmem %s390_s21, 256  ;;  %p599_p11 = scmp.lt.s32.totalorder %s390_s21, %s390_s21 }
  0x3a   :  { %v445_v9 = vpack.c.bf16 %v113_v6, %v111_v4  ;;  %v447_v10 = vpack.c.bf16 %v118_v8, %v116_v7  ;;  %v115_v11 = vld [vmem:[#allocation5 + $0x20] sm:$0xff]  ;;  %v117_v12 = vld [vmem:[#allocation5 + $0x30] sm:$0xff]  ;;  %v120_v13 = vld [vmem:[#allocation5 + $0x48] sm:$0xff]  ;;  %p595_p10 = scmp.ne.s32.totalorder %s390_s21, %s594_s22  ;;  %p600_p12 = scmp.lt.s32.totalorder %s594_s22, %s594_s22 }
  0x3b   :  { %444 = vmatprep.subr.bf16.mxu0 %v443_v5  ;;  %v122_v14 = vld [vmem:[#allocation5 + $0x58] sm:$0xff]  ;;  %v449_v15 = vpack.c.bf16 %v117_v12, %v115_v11  ;;  %v119_v17 = vld [vmem:[#allocation5 + $0x40] sm:$0xff]  ;;  %v121_v18 = vld [vmem:[#allocation5 + $0x50] sm:$0xff] }
  0x3c   :  { %72 = vadd.xlane.f32.xlu0 %v69_v1  ;;  %446 = vmatpush1.bf16.msra.mxu0 %v445_v9  ;;  %v451_v16 = vpack.c.bf16 %v122_v14, %v120_v13  ;;  %v453_v19 = vpack.c.bf16 %v121_v18, %v119_v17  ;;  %v124_v28 = vld [vmem:[#allocation5 + $0x68] sm:$0xff]  ;;  %v126_v29 = vld [vmem:[#allocation5 + $0x78] sm:$0xff]  ;;  %v123_v31 = vld [vmem:[#allocation5 + $0x60] sm:$0xff]  ;;  %p601_p13 = por %p600_p12, %p599_p11 }
  0x3d   :  { %448 = vmatprep.subr.bf16.mxu0 %v447_v10  ;;  %v455_v30 = vpack.c.bf16 %v126_v29, %v124_v28  ;;  %v125_v32 = vld [vmem:[#allocation5 + $0x70] sm:$0xff]  ;;  %v128_v34 = vld [vmem:[#allocation5 + $0x88] sm:$0xff]  ;;  %v130_v35 = vld [vmem:[#allocation5 + $0x98] sm:$0xff] }
  0x3e   :  { %v457_v33 = vpack.c.bf16 %v125_v32, %v123_v31  ;;  %v459_v36 = vpack.c.bf16 %v130_v35, %v128_v34  ;;  %v127_v37 = vld [vmem:[#allocation5 + $0x80] sm:$0xff]  ;;  %v129_v38 = vld [vmem:[#allocation5 + $0x90] sm:$0xff]  ;;  %v132_v40 = vld [vmem:[#allocation5 + $0xa8] sm:$0xff]  ;;  %p602_p0 = pnand %p601_p13, %p595_p10 }
  0x3f   :  { %v461_v39 = vpack.c.bf16 %v129_v38, %v127_v37  ;;  %v134_v41 = vld [vmem:[#allocation5 + $0xb8] sm:$0xff]  ;;  %v131_v43 = vld [vmem:[#allocation5 + $0xa0] sm:$0xff]  ;;  %v133_v44 = vld [vmem:[#allocation5 + $0xb0] sm:$0xff] }
  0x40   :  { %450 = vmatpush1.bf16.msra.mxu0 %v449_v15  ;;  %v463_v42 = vpack.c.bf16 %v134_v41, %v132_v40  ;;  %v465_v45 = vpack.c.bf16 %v133_v44, %v131_v43  ;;  %v136_v46 = vld [vmem:[#allocation5 + $0xc8] sm:$0xff]  ;;  %v138_v47 = vld [vmem:[#allocation5 + $0xd8] sm:$0xff]  ;;  %v135_v48 = vld [vmem:[#allocation5 + $0xc0] sm:$0xff] }
  0x41   :  { %452 = vmatprep.subr.bf16.mxu0 %v451_v16  ;;  %v467_v49 = vpack.c.bf16 %v138_v47, %v136_v46  ;;  %v137_v50 = vld [vmem:[#allocation5 + $0xd0] sm:$0xff]  ;;  %v140_v51 = vld [vmem:[#allocation5 + $0xe8] sm:$0xff]  ;;  %v142_v52 = vld [vmem:[#allocation5 + $0xf8] sm:$0xff] }
  0x42   :  { %v469_v54 = vpack.c.bf16 %v137_v50, %v135_v48  ;;  %v471_v55 = vpack.c.bf16 %v142_v52, %v140_v51  ;;  %v139_v56 = vld [vmem:[#allocation5 + $0xe0] sm:$0xff]  ;;  %v141_v57 = vld [vmem:[#allocation5 + $0xf0] sm:$0xff]  ;;  %v285_v12 = vld [vmem:[#allocation7 + $0x88] sm:$0xff] }
  0x43   :  { %v473_v58 = vpack.c.bf16 %v141_v57, %v139_v56  ;;  %v402_v2 = vld [vmem:[%s741_s1] ss:$0 sm:$0xff]  ;;  %v284_v11 = vld [vmem:[#allocation7 + $0x80] sm:$0xff]  ;;  %v269_v15 = vld [vmem:[#allocation7 + $0x8] sm:$0xff] }
  0x44   :  { %454 = vmatpush1.bf16.msra.mxu0 %v453_v19  ;;  %v403_v4 = vld [vmem:[%s742_s2] ss:$0 sm:$0xff]  ;;  %v475_v13 = vpack.c.bf16 %v285_v12, %v284_v11  ;;  %v268_v14 = vld [vmem:[#allocation7] sm:$0xff]  ;;  %v287_v18 = vld [vmem:[#allocation7 + $0x98] sm:$0xff] }
  0x45   :  { %456 = vmatprep.subr.bf16.mxu0 %v455_v30  ;;  %v477_v16 = vpack.c.bf16 %v269_v15, %v268_v14  ;;  %v286_v17 = vld [vmem:[#allocation7 + $0x90] sm:$0xff]  ;;  %v291_v30 = vld [vmem:[#allocation7 + $0xb8] sm:$0xff]  ;;  %v292_v35 = vld [vmem:[#allocation7 + $0xc0] sm:$0xff] }
  0x46   :  { %476 = vmatprep.subr.bf16.mxu1 %v475_v13  ;;  %v479_v19 = vpack.c.bf16 %v287_v18, %v286_v17  ;;  %v290_v29 = vld [vmem:[#allocation7 + $0xb0] sm:$0xff]  ;;  %v276_v38 = vld [vmem:[#allocation7 + $0x40] sm:$0xff]  ;;  %v297_v47 = vld [vmem:[#allocation7 + $0xe8] sm:$0xff] }
  0x47   :  { %478 = vmatpush3.bf16.msra.mxu1 %v477_v16  ;;  %v487_v31 = vpack.c.bf16 %v291_v30, %v290_v29  ;;  %v274_v32 = vld [vmem:[#allocation7 + $0x30] sm:$0xff]  ;;  %v296_v46 = vld [vmem:[#allocation7 + $0xe0] sm:$0xff]  ;;  %v281_v51 = vld [vmem:[#allocation7 + $0x68] sm:$0xff] }
  0x48   :  { %458 = vmatpush1.bf16.msra.mxu0 %v457_v33  ;;  %480 = vmatprep.subr.bf16.mxu1 %v479_v19  ;;  %v275_v33 = vld [vmem:[#allocation7 + $0x38] sm:$0xff]  ;;  %v294_v41 = vld [vmem:[#allocation7 + $0xd0] sm:$0xff]  ;;  %v280_v50 = vld [vmem:[#allocation7 + $0x60] sm:$0xff] }
  0x49   :  { %460 = vmatprep.subr.bf16.mxu0 %v459_v36  ;;  %v489_v34 = vpack.c.bf16 %v275_v33, %v274_v32  ;;  %v293_v36 = vld [vmem:[#allocation7 + $0xc8] sm:$0xff]  ;;  %v278_v43 = vld [vmem:[#allocation7 + $0x50] sm:$0xff]  ;;  %v283_v57 = vld [vmem:[#allocation7 + $0x78] sm:$0xff] }
  0x4a   :  { %v491_v37 = vpack.c.bf16 %v293_v36, %v292_v35  ;;  %v298_v52 = vld [vmem:[#allocation7 + $0xf0] sm:$0xff] }
  0x4b   :  { %v282_v56 = vld [vmem:[#allocation7 + $0x70] sm:$0xff] }
  0x4c   :  { %462 = vmatpush1.bf16.msra.mxu0 %v461_v39  ;;  %v277_v39 = vld [vmem:[#allocation7 + $0x48] sm:$0xff] }
  0x4d   :  { %464 = vmatprep.subr.bf16.mxu0 %v463_v42  ;;  %v493_v40 = vpack.c.bf16 %v277_v39, %v276_v38  ;;  %v295_v42 = vld [vmem:[#allocation7 + $0xd8] sm:$0xff] }
  0x4e   :  { %v495_v44 = vpack.c.bf16 %v295_v42, %v294_v41 }
  0x50   :  { %466 = vmatpush1.bf16.msra.mxu0 %v465_v45  ;;  %v279_v45 = vld [vmem:[#allocation7 + $0x58] sm:$0xff] }
  0x51   :  { %468 = vmatprep.subr.bf16.mxu0 %v467_v49  ;;  %v497_v48 = vpack.c.bf16 %v279_v45, %v278_v43  ;;  %v499_v49 = vpack.c.bf16 %v297_v47, %v296_v46  ;;  %v404_v47 = vld [vmem:[%s746_s6] ss:$0 sm:$0xff] }
  0x54   :  { %470 = vmatpush1.bf16.msra.mxu0 %v469_v54  ;;  %v501_v54 = vpack.c.bf16 %v281_v51, %v280_v50 }
  0x55   :  { %472 = vmatprep.subr.bf16.mxu0 %v471_v55 }
  0x58   :  { %474 = vmatpush1.bf16.msra.mxu0 %v473_v58  ;;  %v505_v58 = vpack.c.bf16 %v283_v57, %v282_v56 }
  0xc5   :  { %v71_v20 = vpop.xlane.xlu0 %70 }
  0xc6   :  { %v75_v21 = vmul.f32 0.0078125, %v71_v20  ;;  %v270_v20 = vld [vmem:[#allocation7 + $0x10] sm:$0xff] }
  0xc8   :  { %v77_v22 = vsub.f32 %v68_v0, %v75_v21  ;;  %v271_v21 = vld [vmem:[#allocation7 + $0x18] sm:$0xff] }
  0xc9   :  { %v73_v23 = vpop.xlane.xlu0 %72 }
  0xca   :  { %v76_v24 = vmul.f32 0.0078125, %v73_v23  ;;  %v79_v25 = vmul.f32 %v77_v22, %v77_v22  ;;  %v288_v23 = vld [vmem:[#allocation7 + $0xa0] sm:$0xff] }
  0xcc   :  { %v78_v26 = vsub.f32 %v69_v1, %v76_v24  ;;  %81 = vadd.xlane.f32.xlu1 %v79_v25  ;;  %v289_v24 = vld [vmem:[#allocation7 + $0xa8] sm:$0xff] }
  0xcd   :  { %v483_v25 = vpack.c.bf16 %v289_v24, %v288_v23 }
  0xce   :  { %v80_v27 = vmul.f32 %v78_v26, %v78_v26 }
  0xd0   :  { %83 = vadd.xlane.f32.xlu1 %v80_v27  ;;  %v273_v27 = vld [vmem:[#allocation7 + $0x28] sm:$0xff] }
 0x159   :  { %v82_v59 = vpop.xlane.xlu1 %81 }
 0x15a   :  { %v85_v60 = vmul.f32 0.0078125, %v82_v59  ;;  %v145_v59 = vlaneseq }
 0x15c   :  { %v87_v61 = vadd.f32 1e-05, %v85_v60  ;;  %v146_v60 = vshrl.u32 %v145_v59, 7 }
 0x15d   :  { %v84_v62 = vpop.xlane.xlu1 %83 }
 0x15e   :  { %516 = vrsqrt.f32 %v87_v61  ;;  %v86_v63 = vmul.f32 0.0078125, %v84_v62  ;;  %v147_v61 = vsub.s32 0, %v146_v60  ;;  %v143_v62 = vld [vmem:[%s744_s4] sm:$0x3] }
 0x160   :  { %v88_v0 = vadd.f32 1e-05, %v86_v63  ;;  %v151_v63 = vsub.s32 1, %v146_v60 }
 0x162   :  { %518 = vrsqrt.f32 %v88_v0  ;;  %v148_v0 = vrot.slane %v143_v62, %v147_v61 }
 0x168   :  { %v517_v1 = vpop.eup %516 }
 0x169   :  { %v91_v3 = vmul.f32 %v517_v1, %v77_v22  ;;  %v481_v22 = vpack.c.bf16 %v271_v21, %v270_v20  ;;  %v152_v1 = vrot.slane %v143_v62, %v151_v63 }
 0x16b   :  { %v100_v5 = vmul.f32 %v402_v2, %v91_v3  ;;  %482 = vmatpush3.bf16.msra.mxu1 %v481_v22 }
 0x16c   :  { %v519_v6 = vpop.eup %518  ;;  %484 = vmatprep.subr.bf16.mxu1 %v483_v25 }
 0x16d   :  { %v109_v7 = vadd.f32 %v403_v4, %v100_v5  ;;  %v92_v8 = vmul.f32 %v519_v6, %v78_v26  ;;  %v272_v26 = vld [vmem:[#allocation7 + $0x20] sm:$0xff] }
 0x16e   :  { %v485_v28 = vpack.c.bf16 %v273_v27, %v272_v26 }
 0x16f   :  { %220 = vmatmul.mubr.f32.vlgmr.msra.gmra.mrb[0].mxu0 %v109_v7  ;;  %v101_v9 = vmul.f32 %v402_v2, %v92_v8 }
 0x170   :  { %225 = vmatprep.mubr.f32.mxu0 %v629_v53  ;;  %486 = vmatpush3.bf16.msra.mxu1 %v485_v28  ;;  %v299_v53 = vld [vmem:[#allocation7 + $0xf8] sm:$0xff] }
 0x171   :  { %v110_v10 = vadd.f32 %v403_v4, %v101_v9  ;;  %488 = vmatprep.subr.bf16.mxu1 %v487_v31  ;;  %v503_v55 = vpack.c.bf16 %v299_v53, %v298_v52 }
 0x173   :  { %226 = vmatmul.mubr.f32.gmra.mrb[2].mxu0 %v110_v10 }
 0x174   :  { %490 = vmatpush3.bf16.msra.mxu1 %v489_v34 }
 0x175   :  { %492 = vmatprep.subr.bf16.mxu1 %v491_v37 }
 0x178   :  { %494 = vmatpush3.bf16.msra.mxu1 %v493_v40 }
 0x179   :  { %496 = vmatprep.subr.bf16.mxu1 %v495_v44 }
 0x17c   :  { %498 = vmatpush3.bf16.msra.mxu1 %v497_v48 }
 0x17d   :  { %500 = vmatprep.subr.bf16.mxu1 %v499_v49 }
 0x180   :  { %502 = vmatpush3.bf16.msra.mxu1 %v501_v54 }
 0x181   :  { %504 = vmatprep.subr.bf16.mxu1 %v503_v55 }
 0x184   :  { %506 = vmatpush3.bf16.msra.mxu1 %v505_v58 }
 0x242   :  { %v221_v2 = vpop.f32.mrb[0].mxu0 }
 0x243   :  { %v222_v3 = vadd.f32 %v221_v2, %v148_v0  ;;  %v223_v4 = vpop.f32.mrb[1].mxu0 }
 0x244   :  { %v224_v5 = vadd.f32 %v223_v4, %v152_v1 }
 0x245   :  { %v232_v6 = vmul.f32 %v222_v3, %v222_v3 }
 0x246   :  { %v233_v7 = vmul.f32 %v224_v5, %v224_v5  ;;  %v227_v8 = vpop.f32.mrb[2].mxu0 }
 0x247   :  { %v236_v9 = vmul.f32 %v232_v6, %v222_v3  ;;  %v228_v10 = vadd.f32 %v227_v8, %v148_v0  ;;  %v229_v11 = vpop.f32.mrb[3].mxu0 }
 0x248   :  { %v237_v12 = vmul.f32 %v233_v7, %v224_v5  ;;  %v230_v13 = vadd.f32 %v229_v11, %v152_v1 }
 0x249   :  { %v240_v14 = vmul.f32 0.044715, %v236_v9  ;;  %v234_v15 = vmul.f32 %v228_v10, %v228_v10 }
 0x24a   :  { %v235_v16 = vmul.f32 %v230_v13, %v230_v13  ;;  %v241_v17 = vmul.f32 0.044715, %v237_v12 }
 0x24b   :  { %v244_v18 = vadd.f32 %v240_v14, %v222_v3  ;;  %v238_v19 = vmul.f32 %v234_v15, %v228_v10 }
 0x24c   :  { %v239_v20 = vmul.f32 %v235_v16, %v230_v13  ;;  %v245_v21 = vadd.f32 %v241_v17, %v224_v5 }
 0x24d   :  { %v248_v22 = vmul.f32 0.7978846, %v244_v18  ;;  %v242_v23 = vmul.f32 0.044715, %v238_v19 }
 0x24e   :  { %v243_v24 = vmul.f32 0.044715, %v239_v20  ;;  %v249_v25 = vmul.f32 0.7978846, %v245_v21 }
 0x24f   :  { %v246_v26 = vadd.f32 %v242_v23, %v228_v10  ;;  %520 = vtanh.f32 %v248_v22 }
 0x250   :  { %v247_v27 = vadd.f32 %v243_v24, %v230_v13  ;;  %522 = vtanh.f32 %v249_v25 }
 0x251   :  { %v250_v28 = vmul.f32 0.7978846, %v246_v26 }
 0x252   :  { %v251_v29 = vmul.f32 0.7978846, %v247_v27 }
 0x253   :  { %524 = vtanh.f32 %v250_v28 }
 0x254   :  { %526 = vtanh.f32 %v251_v29 }
 0x259   :  { %v521_v30 = vpop.eup %520 }
 0x25a   :  { %v523_v31 = vpop.eup %522  ;;  %v256_v32 = vadd.f32 1.0, %v521_v30 }
 0x25b   :  { %v257_v33 = vadd.f32 1.0, %v523_v31 }
 0x25c   :  { %v260_v34 = vmul.f32 0.5, %v256_v32 }
 0x25d   :  { %v525_v35 = vpop.eup %524  ;;  %v261_v36 = vmul.f32 0.5, %v257_v33 }
 0x25e   :  { %v527_v37 = vpop.eup %526  ;;  %v258_v38 = vadd.f32 1.0, %v525_v35  ;;  %v264_v41 = vmul.f32 %v260_v34, %v222_v3 }
 0x25f   :  { %v265_v39 = vmul.f32 %v261_v36, %v224_v5  ;;  %v259_v40 = vadd.f32 1.0, %v527_v37 }
 0x260   :  { %v262_v42 = vmul.f32 0.5, %v258_v38 }
 0x261   :  { %371 = vmatprep.mubr.f32.mxu1 %v265_v39  ;;  %v263_v43 = vmul.f32 0.5, %v259_v40 }
 0x262   :  { %372 = vmatmul.mubr.f32.vlgmr.msra.gmra.mrb[0].mxu1 %v264_v41  ;;  %v266_v45 = vmul.f32 %v262_v42, %v228_v10 }
 0x263   :  { %v267_v44 = vmul.f32 %v263_v43, %v230_v13 }
 0x265   :  { %376 = vmatprep.mubr.f32.mxu1 %v267_v44 }
 0x266   :  { %377 = vmatmul.mubr.f32.gmra.mrb[2].mxu1 %v266_v45 }
 0x335   :  { %v437_v46 = vpop.f32.mrb[0].mxu1 }
 0x336   :  { %v438_v48 = vpop.f32.mrb[1].mxu1 }
 0x337   :  { %v439_v49 = vadd.f32 %v438_v48, %v437_v46 }
 0x339   :  { %v374_v50 = vadd.f32 %v439_v49, %v404_v47  ;;  %v440_v51 = vpop.f32.mrb[2].mxu1 }
 0x33a   :  { %v441_v52 = vpop.f32.mrb[3].mxu1 }
 0x33b   :  { %382 = vst [vmem:[#allocation8] sm:$0xff] %v374_v50  ;;  %v442_v53 = vadd.f32 %v441_v52, %v440_v51 }
 0x33d   :  { %v379_v54 = vadd.f32 %v442_v53, %v404_v47 }
 0x33f   :  { %383 = vst [vmem:[#allocation8 + $0x8] sm:$0xff] %v379_v54 }
 0x340   :  { %605 = shalt.err (!%p602_p0)
}
 0x341   :  { %s606_s24 = scalar_lea.hbm %s747_s7, 256 }
 0x342   :  { %p607_p1 = scmp.ne.s32.totalorder %s747_s7, %s606_s24  ;;  %p610_p2 = scmp.lt.u32.totalorder %s606_s24, %s747_s7 }
 0x344   :  { %p612_p3 = pnand %p610_p2, %p607_p1 }
 0x346   :  { %615 = shalt.err (!%p612_p3)
}
 0x347   :  { %395 = dma.vmem_to_hbm [thread:$0]  %s390_s21, 256, %s747_s7, [#allocation4], %s626_s3, %s626_s3, %s627_s25  }
 0x348   :  { %620 = dma.done.wait [#allocation4], 256  }
 0x349   :  { %621 = vsyncadd [#allocation4], 4294967040 }
 0x34a   :  { %399 = vsyncpa [#allocation3], 1 }
 0x34b   :  { %400 = vsyncpa [#allocation6], 1 }
 0x34c   :  { %401 = vsyncpa [#allocation4], 1 }

</bundles_post_ra>
